<compile_context>
chip_gen: v5e
topology: v5e:2x2
jax: 0.10.0
libtpu: 0.0.40
codegen_flags: <defaults>
</compile_context>

<pallas_src>
import functools

import jax
import jax.numpy as jnp
from jax.experimental import pallas as pl
from jax.experimental.pallas import tpu as pltpu

_LANE = 128      # vreg lane width
_SUBLANE = 8     # vreg sublane count (f32)


def _round_up(v, m):
    return ((v + m - 1) // m) * m


def _decoder_kernel(x_ref, w1_ref, b1_ref, w2_ref, b2_ref, o_ref):
    # x_ref:  [TN, H]      w1_ref: [H, Hp]   b1_ref: [1, Hp]
    # w2_ref: [Hp, O]      b2_ref: [1, O]    o_ref:  [TN, O]
    x = x_ref[...]
    h = jnp.dot(x, w1_ref[...], preferred_element_type=jnp.float32) + b1_ref[...]
    h = jnp.maximum(h, 0.0)                       # ReLU, f32, lane-dense (Hp=128)
    y = jnp.dot(h, w2_ref[...], preferred_element_type=jnp.float32) + b2_ref[...]
    o_ref[...] = y.astype(o_ref.dtype)


def prepare_params(w1, b1, w2, b2):
    """One-time (init-time) weight prep: pad the hidden dim to a multiple of 128.

    Zero columns of W1/b1 and zero rows of W2 leave the result exactly
    unchanged (relu(0) = 0 contributes nothing to the second matmul).
    """
    hdim = w1.shape[0]
    h_pad = _round_up(max(hdim, _LANE), _LANE)
    if h_pad != hdim:
        w1 = jnp.pad(w1, ((0, 0), (0, h_pad - hdim)))
        b1 = jnp.pad(b1, ((0, 0), (0, h_pad - hdim)))
        w2 = jnp.pad(w2, ((0, h_pad - hdim), (0, 0)))
    return w1, b1, w2, b2


@functools.partial(jax.jit, static_argnames=("tile_n",))
def my_decoder(x, w1p, b1p, w2p, b2, *, tile_n=2048):
    """x: [N, H] f32.  w1p/b1p/w2p must come from prepare_params()."""
    n, hdim = x.shape
    h_pad = w1p.shape[1]
    o = w2p.shape[1]
    dt = x.dtype.itemsize

    # ---- row tiling: balanced tiles, ragged last block via cdiv grid (no
    #      wrapper-side padding of x, no output slice).  Force >= 2 grid steps
    #      when there are enough rows so v7x's 2 TensorCores both get work.
    num_tiles = pl.cdiv(n, tile_n)
    if n >= 2 * _SUBLANE:
        num_tiles = max(num_tiles, 2)
    eff_tile = _round_up(pl.cdiv(n, num_tiles), _SUBLANE)
    grid = (pl.cdiv(n, eff_tile),)

    cost = pl.CostEstimate(
        flops=2 * n * hdim * h_pad + 2 * n * h_pad * o,
        transcendentals=0,
        bytes_accessed=(n * hdim                 # x read
                        + hdim * h_pad + h_pad   # W1, b1
                        + h_pad * o + o          # W2, b2
                        + n * o) * dt,           # output write
    )

    return pl.pallas_call(
        _decoder_kernel,
        out_shape=jax.ShapeDtypeStruct((n, o), x.dtype),
        grid_spec=pltpu.PrefetchScalarGridSpec(
            num_scalar_prefetch=0,
            grid=grid,
            in_specs=[
                pl.BlockSpec((eff_tile, hdim), lambda i: (i, 0)),   # x tile
                pl.BlockSpec((hdim, h_pad), lambda i: (0, 0)),      # W1 (padded)
                pl.BlockSpec((1, h_pad), lambda i: (0, 0)),         # b1 (padded)
                pl.BlockSpec((h_pad, o), lambda i: (0, 0)),         # W2 (padded)
                pl.BlockSpec((1, o), lambda i: (0, 0)),             # b2
            ],
            out_specs=pl.BlockSpec((eff_tile, o), lambda i: (i, 0)),
        ),
        compiler_params=pltpu.CompilerParams(
            dimension_semantics=("parallel",),   # rows shard across TCs (v7x)
            vmem_limit_bytes=32 * 1024 * 1024,   # explicit budget, safe on v5e..v7x
        ),
        cost_estimate=cost,
    )(x, w1p, b1p, w2p, b2)


def reference(x, w1, b1, w2, b2):
    h = jnp.maximum(x @ w1 + b1, 0.0)
    return h @ w2 + b2


if __name__ == "__main__":
    # Small shapes consistent with the module: N nodes, hidden_dim, output_dim.
    N, HIDDEN, OUT = 128, 32, 16

    key = jax.random.PRNGKey(0)
    kx, k1, kb1, k2, kb2 = jax.random.split(key, 5)

    x = jax.random.normal(kx, (N, HIDDEN), dtype=jnp.float32)

    # Deterministic parameter init (uniform, like PyTorch Linear's default range).
    bound = 1.0 / (HIDDEN ** 0.5)
    w1 = jax.random.uniform(k1, (HIDDEN, HIDDEN), jnp.float32, -bound, bound)
    b1 = jax.random.uniform(kb1, (1, HIDDEN), jnp.float32, -bound, bound)
    w2 = jax.random.uniform(k2, (HIDDEN, OUT), jnp.float32, -bound, bound)
    b2 = jax.random.uniform(kb2, (1, OUT), jnp.float32, -bound, bound)

    # One-time weight prep (hidden-dim zero padding), hoisted out of the hot path.
    w1p, b1p, w2p, b2p = prepare_params(w1, b1, w2, b2)

    out = jax.block_until_ready(my_decoder(x, w1p, b1p, w2p, b2p))
    ref = reference(x, w1, b1, w2, b2)
    assert out.shape == (N, OUT)
    assert jnp.allclose(out, ref, atol=1e-5, rtol=1e-5), "mismatch vs reference"

    # Also exercise a non-divisible, larger row count (ragged last block,
    # multi-step grid, balanced tiles).
    x2 = jax.random.normal(kx, (2500, HIDDEN), dtype=jnp.float32)
    out2 = jax.block_until_ready(my_decoder(x2, w1p, b1p, w2p, b2p, tile_n=1024))
    assert out2.shape == (2500, OUT)
    assert jnp.allclose(out2, reference(x2, w1, b1, w2, b2), atol=1e-5, rtol=1e-5)

    print("KERNEL_OK")
</pallas_src>

<mosaic_0001>
module attributes {stable_mosaic.version = 11 : i64} {
  func.func @_decoder_kernel(%arg0: i32, %arg1: memref<64x32xf32, #tpu.memory_space<vmem>>, %arg2: memref<32x128xf32, #tpu.memory_space<vmem>>, %arg3: memref<1x128xf32, #tpu.memory_space<vmem>>, %arg4: memref<128x16xf32, #tpu.memory_space<vmem>>, %arg5: memref<1x16xf32, #tpu.memory_space<vmem>>, %arg6: memref<64x16xf32, #tpu.memory_space<vmem>>) attributes {dimension_semantics = [#tpu.dimension_semantics<parallel>], iteration_bounds = array<i64: 2>, scalar_prefetch = 0 : i64, scratch_operands = 0 : i64, tpu.core_type = #tpu.core_type<tc>, window_params = [{transform_indices = @transform_0, window_bounds = array<i64: 64, 32>}, {pipeline_mode = #tpu.pipeline_mode<synchronous>, transform_indices = @transform_1, window_bounds = array<i64: 32, 128>}, {pipeline_mode = #tpu.pipeline_mode<synchronous>, transform_indices = @transform_2, window_bounds = array<i64: 1, 128>}, {pipeline_mode = #tpu.pipeline_mode<synchronous>, transform_indices = @transform_3, window_bounds = array<i64: 128, 16>}, {pipeline_mode = #tpu.pipeline_mode<synchronous>, transform_indices = @transform_4, window_bounds = array<i64: 1, 16>}, {transform_indices = @transform_5, window_bounds = array<i64: 64, 16>}]} {
    %c0 = arith.constant 0 : index
    %c0_0 = arith.constant 0 : index
    %0 = vector.load %arg1[%c0, %c0_0] : memref<64x32xf32, #tpu.memory_space<vmem>>, vector<64x32xf32>
    %c0_1 = arith.constant 0 : index
    %c0_2 = arith.constant 0 : index
    %1 = vector.load %arg2[%c0_1, %c0_2] : memref<32x128xf32, #tpu.memory_space<vmem>>, vector<32x128xf32>
    %cst = arith.constant dense<0.000000e+00> : vector<64x128xf32>
    %2 = tpu.matmul %0, %1, %cst {dimension_numbers = #tpu.dot_dimension_numbers<[1], [0], [0], [1], [0, 0, 1, 1], [], []>} : vector<64x32xf32>, vector<32x128xf32>, vector<64x128xf32> -> vector<64x128xf32>
    %c0_3 = arith.constant 0 : index
    %c0_4 = arith.constant 0 : index
    %3 = vector.load %arg3[%c0_3, %c0_4] : memref<1x128xf32, #tpu.memory_space<vmem>>, vector<1x128xf32>
    %4 = vector.broadcast %3 : vector<1x128xf32> to vector<64x128xf32>
    %5 = arith.addf %2, %4 : vector<64x128xf32>
    %cst_5 = arith.constant 0.000000e+00 : f32
    %6 = vector.broadcast %cst_5 : f32 to vector<64x128xf32>
    %7 = arith.maximumf %5, %6 : vector<64x128xf32>
    %c0_6 = arith.constant 0 : index
    %c0_7 = arith.constant 0 : index
    %8 = vector.load %arg4[%c0_6, %c0_7] : memref<128x16xf32, #tpu.memory_space<vmem>>, vector<128x16xf32>
    %cst_8 = arith.constant dense<0.000000e+00> : vector<64x16xf32>
    %9 = tpu.matmul %7, %8, %cst_8 {dimension_numbers = #tpu.dot_dimension_numbers<[1], [0], [0], [1], [0, 0, 1, 1], [], []>} : vector<64x128xf32>, vector<128x16xf32>, vector<64x16xf32> -> vector<64x16xf32>
    %c0_9 = arith.constant 0 : index
    %c0_10 = arith.constant 0 : index
    %10 = vector.load %arg5[%c0_9, %c0_10] : memref<1x16xf32, #tpu.memory_space<vmem>>, vector<1x16xf32>
    %11 = vector.broadcast %10 : vector<1x16xf32> to vector<64x16xf32>
    %12 = arith.addf %9, %11 : vector<64x16xf32>
    %c0_11 = arith.constant 0 : index
    %c0_12 = arith.constant 0 : index
    %13 = vector.load %arg6[%c0_11, %c0_12] : memref<64x16xf32, #tpu.memory_space<vmem>>, vector<64x16xf32>
    tpu.vector_store %arg6[%c0_11, %c0_12], %12 {strides = array<i32>} : memref<64x16xf32, #tpu.memory_space<vmem>>, vector<64x16xf32>,
    return
  }
  func.func @transform_0(%arg0: i32) -> (i32, i32) {
    %c0_i32 = arith.constant 0 : i32
    %c0_i32_0 = arith.constant 0 : i32
    return %arg0, %c0_i32 : i32, i32
  }
  func.func @transform_1(%arg0: i32) -> (i32, i32) {
    %c0_i32 = arith.constant 0 : i32
    %c0_i32_0 = arith.constant 0 : i32
    %c0_i32_1 = arith.constant 0 : i32
    return %c0_i32, %c0_i32_0 : i32, i32
  }
  func.func @transform_2(%arg0: i32) -> (i32, i32) {
    %c0_i32 = arith.constant 0 : i32
    %c0_i32_0 = arith.constant 0 : i32
    %c0_i32_1 = arith.constant 0 : i32
    return %c0_i32, %c0_i32_0 : i32, i32
  }
  func.func @transform_3(%arg0: i32) -> (i32, i32) {
    %c0_i32 = arith.constant 0 : i32
    %c0_i32_0 = arith.constant 0 : i32
    %c0_i32_1 = arith.constant 0 : i32
    return %c0_i32, %c0_i32_0 : i32, i32
  }
  func.func @transform_4(%arg0: i32) -> (i32, i32) {
    %c0_i32 = arith.constant 0 : i32
    %c0_i32_0 = arith.constant 0 : i32
    %c0_i32_1 = arith.constant 0 : i32
    return %c0_i32, %c0_i32_0 : i32, i32
  }
  func.func @transform_5(%arg0: i32) -> (i32, i32) {
    %c0_i32 = arith.constant 0 : i32
    %c0_i32_0 = arith.constant 0 : i32
    return %arg0, %c0_i32 : i32, i32
  }
}

</mosaic_0001>

<bundles_post_ra>
// kernel: my_decoder.1
= control target key start
LH: loop header
LB: loop body
LE: loop exit
PB: predicated region body
PF: predicated region fallthrough
CT: control target
= control target key end

     0   :  { %s547_s18 = smov 0   ;;  %s663_s0 = inlined_call_operand.vmem [shape: f32[128,32], index: 0, kind: input, shape index: {}]   ;;  %s664_s1 = inlined_call_operand.vmem [shape: f32[32,128], index: 1, kind: input, shape index: {}]   ;;  %s665_s2 = inlined_call_operand.vmem [shape: f32[1,128], index: 2, kind: input, shape index: {}]   ;;  %s666_s3 = inlined_call_operand.vmem [shape: f32[128,16], index: 3, kind: input, shape index: {}]   ;;  %s667_s4 = inlined_call_operand.vmem [shape: f32[1,16], index: 4, kind: input, shape index: {}]   ;;  %s668_s5 = inlined_call_operand.vmem [shape: f32[128,16], index: 5, kind: output, shape index: {}]  }
   0x1 LB: > { %s444_s19 = sadd.s32 4294967295, %s515_s18   ;;  %p448_p0 = scmp.ge.s32.totalorder %s515_s18, 1  ;;  %s515_s18 = sphi %s547_s18, %s15_s18  }
   0x2   : > { %p188_p1 = scmp.lt.s32.totalorder %s515_s18, 3 }
   0x4   : > { %p189_p2 = pnand %p448_p0, %p188_p1 }
   0x5   : > { %s449_s24 = sshll.u32 (!%p189_p2), %s444_s19, 3 }
   0x6   : > { %192 = sbr.rel (%p189_p2) target bundleno = 324 (0x144), region = 40  ;;  %p217_p3 = scmp.lt.s32.totalorder (!%p189_p2), %s449_s24, 15 }
   0xb   : > { %v239_v0 = vld [vmem:[%s664_s1 + $0x18] sm:$0xff]  ;;  %v238_v1 = vld [vmem:[%s664_s1 + $0x10] sm:$0xff]  ;;  %v237_v2 = vld [vmem:[%s664_s1 + $0x8] sm:$0xff]  ;;  %s670_s24 = smov (!%p217_p3, %s449_s24), 15  ;;  %vm244_vm0 = vcmask 261120   ;;  %vm379_vm1 = vcmask 130048  }
   0xc   : > { %281 = vmatpush.msra.mxu0 %v239_v0  ;;  %463 = vmatpush.msra.mxu3 %v239_v0  ;;  %v236_v3 = vld [vmem:[%s664_s1] sm:$0xff]  ;;  %s450_s29 = sshll.u32 %s670_s24, 3  ;;  %v333_v8 = vld [vmem:[%s666_s3 + $0x78] sm:$0xff]  ;;  %v332_v9 = vld [vmem:[%s666_s3 + $0x70] sm:$0xff] }
   0xd   : > { %s575_s7 = scalar_lea.vmem %s663_s0, %s450_s29  ;;  %338 = vmatpush.msra.mxu1 %v333_v8  ;;  %v331_v10 = vld [vmem:[%s666_s3 + $0x68] sm:$0xff]  ;;  %467 = vmatpush.msra.mxu2 %v333_v8  ;;  %v330_v11 = vld [vmem:[%s666_s3 + $0x60] sm:$0xff]  ;;  %v329_v13 = vld [vmem:[%s666_s3 + $0x58] sm:$0xff]  ;;  %s226_s26 = scalar_lea.vmem %s668_s5, %s450_s29 }
   0xe   : > { %282 = vmatpush.msra.mxu0 %v238_v1  ;;  %464 = vmatpush.msra.mxu3 %v238_v1  ;;  %v228_v4 = vld [vmem:[%s575_s7] sm:$0xff]  ;;  %v234_v5 = vld [vmem:[%s575_s7 + $0x30] sm:$0xff]  ;;  %v229_v6 = vld [vmem:[%s575_s7 + $0x8] sm:$0xff] }
   0xf   : > { %v235_v7 = vld [vmem:[%s575_s7 + $0x38] sm:$0xff]  ;;  %339 = vmatpush.msra.mxu1 %v332_v9  ;;  %469 = vmatpush.msra.mxu2 %v332_v9  ;;  %v230_v12 = vld [vmem:[%s575_s7 + $0x10] sm:$0xff]  ;;  %v327_v15 = vld [vmem:[%s666_s3 + $0x48] sm:$0xff] }
  0x10   : > { %283 = vmatpush.msra.mxu0 %v237_v2  ;;  %465 = vmatpush.msra.mxu3 %v237_v2  ;;  %v328_v14 = vld [vmem:[%s666_s3 + $0x50] sm:$0xff]  ;;  %v326_v16 = vld [vmem:[%s666_s3 + $0x40] sm:$0xff]  ;;  %v231_v17 = vld [vmem:[%s575_s7 + $0x18] sm:$0xff] }
  0x11   : > { %340 = vmatpush.msra.mxu1 %v331_v10  ;;  %471 = vmatpush.msra.mxu2 %v331_v10  ;;  %v325_v18 = vld [vmem:[%s666_s3 + $0x38] sm:$0xff]  ;;  %v324_v19 = vld [vmem:[%s666_s3 + $0x30] sm:$0xff]  ;;  %v323_v20 = vld [vmem:[%s666_s3 + $0x28] sm:$0xff] }
  0x12   : > { %284 = vmatpush.msra.mxu0 %v236_v3  ;;  %466 = vmatpush.msra.mxu3 %v236_v3  ;;  %v322_v21 = vld [vmem:[%s666_s3 + $0x20] sm:$0xff]  ;;  %v321_v23 = vld [vmem:[%s666_s3 + $0x18] sm:$0xff]  ;;  %v233_v24 = vld [vmem:[%s575_s7 + $0x28] sm:$0xff] }
  0x13   : > { %453 = vmatmul.msk.f32.vlgmr.msra.gmra.mxu0 %vm244_vm0, %v228_v4  ;;  %459 = vmatmul.msk.f32.vlgmr.msra.gmra.mxu3 %vm244_vm0, %v234_v5  ;;  %v232_v22 = vld [vmem:[%s575_s7 + $0x20] sm:$0xff]  ;;  %v320_v25 = vld [vmem:[%s666_s3 + $0x10] sm:$0xff]  ;;  %v319_v26 = vld [vmem:[%s666_s3 + $0x8] sm:$0xff] }
  0x14   : > { %468 = vmatpush.msrb.mxu3 %v333_v8  ;;  %341 = vmatpush.msra.mxu1 %v330_v11  ;;  %v318_v27 = vld [vmem:[%s666_s3] sm:$0xff] }
  0x15   : > { %473 = vmatpush.msra.mxu2 %v330_v11  ;;  %v507_v28 = vld [vmem:[%s665_s2] ss:$0 sm:$0xff] }
  0x16   : > { %470 = vmatpush.msrb.mxu3 %v332_v9  ;;  %342 = vmatpush.msra.mxu1 %v329_v13  ;;  %v508_v53 = vld [vmem:[%s667_s4] ss:$0 sm:$0xff] }
  0x17   : > { %475 = vmatpush.msra.mxu2 %v329_v13 }
  0x18   : > { %472 = vmatpush.msrb.mxu3 %v331_v10  ;;  %343 = vmatpush.msra.mxu1 %v328_v14 }
  0x19   : > { %477 = vmatpush.msra.mxu2 %v328_v14 }
  0x1a   : > { %474 = vmatpush.msrb.mxu3 %v330_v11  ;;  %344 = vmatpush.msra.mxu1 %v327_v15 }
  0x1b   : > { %454 = vmatmul.msk.f32.gmra.mxu0 %vm244_vm0, %v229_v6  ;;  %460 = vmatmul.msk.f32.gmra.mxu3 %vm244_vm0, %v235_v7 }
  0x1c   : > { %476 = vmatpush.msrb.mxu3 %v329_v13  ;;  %479 = vmatpush.msra.mxu2 %v327_v15 }
  0x1d   : > { %345 = vmatpush.msra.mxu1 %v326_v16 }
  0x1e   : > { %478 = vmatpush.msrb.mxu3 %v328_v14  ;;  %481 = vmatpush.msra.mxu2 %v326_v16 }
  0x1f   : > { %346 = vmatpush.msra.mxu1 %v325_v18 }
  0x20   : > { %480 = vmatpush.msrb.mxu3 %v327_v15  ;;  %483 = vmatpush.msra.mxu2 %v325_v18 }
  0x21   : > { %347 = vmatpush.msra.mxu1 %v324_v19 }
  0x22   : > { %482 = vmatpush.msrb.mxu3 %v326_v16  ;;  %485 = vmatpush.msra.mxu2 %v324_v19 }
  0x23   : > { %455 = vmatmul.msk.f32.gmra.mxu0 %vm244_vm0, %v230_v12  ;;  %348 = vmatpush.msra.mxu1 %v323_v20 }
  0x24   : > { %484 = vmatpush.msrb.mxu3 %v325_v18  ;;  %487 = vmatpush.msra.mxu2 %v323_v20 }
  0x25   : > { %349 = vmatpush.msra.mxu1 %v322_v21 }
  0x26   : > { %486 = vmatpush.msrb.mxu3 %v324_v19  ;;  %489 = vmatpush.msra.mxu2 %v322_v21 }
  0x27   : > { %350 = vmatpush.msra.mxu1 %v321_v23 }
  0x28   : > { %488 = vmatpush.msrb.mxu3 %v323_v20  ;;  %491 = vmatpush.msra.mxu2 %v321_v23 }
  0x29   : > { %351 = vmatpush.msra.mxu1 %v320_v25 }
  0x2a   : > { %490 = vmatpush.msrb.mxu3 %v322_v21  ;;  %493 = vmatpush.msra.mxu2 %v320_v25 }
  0x2b   : > { %456 = vmatmul.msk.f32.gmra.mxu0 %vm244_vm0, %v231_v17  ;;  %352 = vmatpush.msra.mxu1 %v319_v26 }
  0x2c   : > { %492 = vmatpush.msrb.mxu3 %v321_v23  ;;  %495 = vmatpush.msra.mxu2 %v319_v26 }
  0x2d   : > { %353 = vmatpush.msra.mxu1 %v318_v27 }
  0x2e   : > { %494 = vmatpush.msrb.mxu3 %v320_v25  ;;  %497 = vmatpush.msra.mxu2 %v318_v27 }
  0x30   : > { %496 = vmatpush.msrb.mxu3 %v319_v26 }
  0x32   : > { %498 = vmatpush.msrb.mxu3 %v318_v27 }
  0x33   : > { %457 = vmatmul.msk.f32.gmra.mxu0 %vm244_vm0, %v232_v22 }
  0x3b   : > { %458 = vmatmul.msk.f32.gmra.mxu0 %vm244_vm0, %v233_v24 }
  0x90   : > { %v286_v29 = vpop.f32.mrf.mxu0 }
  0x91   : > { %v287_v30 = vadd.f32 %v507_v28, %v286_v29 }
  0x93   : > { %v310_v31 = vmax.f32 %v287_v30, 0.0 }
  0x95   : > { %354 = vmatmul.f32.vlgmr.msra.gmra.mxu1 %v310_v31 }
  0x96   : > { %v304_v32 = vpop.f32.mrf.mxu3 }
  0x97   : > { %v305_v34 = vadd.f32 %v507_v28, %v304_v32 }
  0x98   : > { %v289_v33 = vpop.f32.mrf.mxu0 }
  0x99   : > { %v290_v35 = vadd.f32 %v507_v28, %v289_v33  ;;  %v316_v36 = vmax.f32 %v305_v34, 0.0 }
  0x9b   : > { %v311_v37 = vmax.f32 %v290_v35, 0.0  ;;  %372 = vmatmul.f32.vlgmr.msrb.gmra.mxu3 %v316_v36 }
  0x9d   : > { %357 = vmatmul.f32.gmra.mxu1 %v311_v37 }
  0x9e   : > { %v307_v38 = vpop.f32.mrf.mxu3 }
  0x9f   : > { %v308_v40 = vadd.f32 %v507_v28, %v307_v38 }
  0xa0   : > { %v292_v39 = vpop.f32.mrf.mxu0 }
  0xa1   : > { %v293_v41 = vadd.f32 %v507_v28, %v292_v39  ;;  %v317_v42 = vmax.f32 %v308_v40, 0.0 }
  0xa3   : > { %v312_v43 = vmax.f32 %v293_v41, 0.0  ;;  %375 = vmatmul.f32.gmra.mxu3 %v317_v42 }
  0xa5   : > { %360 = vmatmul.f32.gmra.mxu1 %v312_v43 }
  0xa8   : > { %v295_v44 = vpop.f32.mrf.mxu0 }
  0xa9   : > { %v296_v45 = vadd.f32 %v507_v28, %v295_v44 }
  0xab   : > { %v313_v46 = vmax.f32 %v296_v45, 0.0 }
  0xad   : > { %363 = vmatmul.f32.vlgmr.msra.gmra.mxu2 %v313_v46 }
  0xb0   : > { %v298_v47 = vpop.f32.mrf.mxu0 }
  0xb1   : > { %v299_v48 = vadd.f32 %v507_v28, %v298_v47 }
  0xb3   : > { %v314_v49 = vmax.f32 %v299_v48, 0.0 }
  0xb5   : > { %366 = vmatmul.f32.gmra.mxu2 %v314_v49 }
  0xb8   : > { %v301_v50 = vpop.f32.mrf.mxu0 }
  0xb9   : > { %v302_v51 = vadd.f32 %v507_v28, %v301_v50 }
  0xbb   : > { %v315_v52 = vmax.f32 %v302_v51, 0.0 }
  0xbd   : > { %369 = vmatmul.f32.gmra.mxu2 %v315_v52 }
 0x112   : > { %v355_v54 = vpop.f32.mrf.mxu1 }
 0x113   : > { %v356_v55 = vadd.f32 %v508_v53, %v355_v54 }
 0x115   : > { %380 = vst.msk [vmem:[%s226_s26] sm:$0xff] %vm379_vm1, %v356_v55 }
 0x11a   : > { %v358_v56 = vpop.f32.mrf.mxu1 }
 0x11b   : > { %v359_v57 = vadd.f32 %v508_v53, %v358_v56 }
 0x11d   : > { %381 = vst.msk [vmem:[%s226_s26 + $0x8] sm:$0xff] %vm379_vm1, %v359_v57 }
 0x11e   : > { %v373_v58 = vpop.f32.mrf.mxu3 }
 0x11f   : > { %v374_v59 = vadd.f32 %v508_v53, %v373_v58 }
 0x121   : > { %386 = vst.msk [vmem:[%s226_s26 + $0x30] sm:$0xff] %vm379_vm1, %v374_v59 }
 0x122   : > { %v361_v60 = vpop.f32.mrf.mxu1 }
 0x123   : > { %v362_v61 = vadd.f32 %v508_v53, %v361_v60 }
 0x125   : > { %382 = vst.msk [vmem:[%s226_s26 + $0x10] sm:$0xff] %vm379_vm1, %v362_v61 }
 0x126   : > { %v376_v62 = vpop.f32.mrf.mxu3 }
 0x127   : > { %v377_v63 = vadd.f32 %v508_v53, %v376_v62 }
 0x129   : > { %387 = vst.msk [vmem:[%s226_s26 + $0x38] sm:$0xff] %vm379_vm1, %v377_v63 }
 0x130   : > { %v364_v0 = vpop.f32.mrf.mxu2 }
 0x131   : > { %v365_v1 = vadd.f32 %v508_v53, %v364_v0 }
 0x133   : > { %383 = vst.msk [vmem:[%s226_s26 + $0x18] sm:$0xff] %vm379_vm1, %v365_v1 }
 0x138   : > { %v367_v2 = vpop.f32.mrf.mxu2 }
 0x139   : > { %v368_v3 = vadd.f32 %v508_v53, %v367_v2 }
 0x13b   : > { %384 = vst.msk [vmem:[%s226_s26 + $0x20] sm:$0xff] %vm379_vm1, %v368_v3 }
 0x140   : > { %v370_v4 = vpop.f32.mrf.mxu2 }
 0x141   : > { %v371_v5 = vadd.f32 %v508_v53, %v370_v4 }
 0x143   : > { %385 = vst.msk [vmem:[%s226_s26 + $0x28] sm:$0xff] %vm379_vm1, %v371_v5 }
 0x144 PF: > { %s15_s18 = sadd.s32 1, %s515_s18  }
 0x145   : > { %p12_p4 = scmp.ge.s32.totalorder %s15_s18, 4  }
 0x147   :  { %14 = sbr.rel (!%p12_p4) target bundleno = 1 (0x1), region = 70 }

</bundles_post_ra>
